<compile_context>
chip_gen: v5e
topology: v5e:2x2
jax: 0.10.0
libtpu: 0.0.40
codegen_flags: <defaults>
</compile_context>

<pallas_src>
import jax
import jax.numpy as jnp
from jax.experimental import pallas as pl
from jax.experimental.pallas import tpu as pltpu


def _round_up(x, m):
    return ((x + m - 1) // m) * m


def _make_ce_kernel(n_true, tile_rows, exp_in_bf16):
    """Per-tile cross-entropy partial sum.

    logits_ref : (tile_rows, C) input-dtype VMEM tile (the last tile may
                 overhang the array; overhanging rows hold undefined data)
    targets_ref: (tile_rows, 1) int32 VMEM tile
    partial_ref: (1, 8, 128)    f32 output block (partial sum broadcast across
                 the block; the wrapper reads [:, 0, 0])
    """

    def kernel(logits_ref, targets_ref, partial_ref):
        logits = logits_ref[...].astype(jnp.float32)           # (tn, C) f32
        tgt = targets_ref[...]                                  # (tn, 1) int32
        tn, c = logits.shape

        # Rows past the true N exist only because the last block overhangs the
        # array; clamp them so max/exp stay finite, and mask them out below.
        row_ids = (pl.program_id(0) * tile_rows
                   + jax.lax.broadcasted_iota(jnp.int32, (tn, 1), 0))
        valid = row_ids < n_true                                # (tn, 1) bool
        logits = jnp.where(valid, logits, 0.0)

        # numerically stable log-sum-exp; only the row max uses the XLU
        row_max = jnp.max(logits, axis=-1, keepdims=True)       # (tn, 1)
        shifted = logits - row_max                               # (tn, C) <= 0
        if exp_in_bf16:
            # bf16 EUP exp (v6e/v7x); accumulation stays f32 on the MXU below.
            exp_vals = jnp.exp(shifted.astype(jnp.bfloat16))
        else:
            exp_vals = jnp.exp(shifted)

        # target-class logit via a vectorized one-hot select (no gather)
        class_ids = jax.lax.broadcasted_iota(jnp.int32, (tn, c), 1)
        onehot_logits = jnp.where(class_ids == tgt, logits, 0.0)

        # Route both row-sums through the otherwise-idle MXU (ones-vector
        # matmuls, f32 accumulation) instead of XLU tree-reduces.
        ones_e = jnp.ones((c, 8), exp_vals.dtype)
        ones_p = jnp.ones((c, 8), jnp.float32)
        sum_exp = jnp.dot(exp_vals, ones_e,
                          preferred_element_type=jnp.float32)[:, 0:1]   # (tn,1)
        picked = jnp.dot(onehot_logits, ones_p,
                         preferred_element_type=jnp.float32)[:, 0:1]    # (tn,1)

        lse = row_max + jnp.log(sum_exp)                         # (tn, 1)
        nll = jnp.where(valid, lse - picked, 0.0)                # (tn, 1)

        # per-tile partial sum, written lane-dense (broadcast over the block)
        partial = jnp.sum(nll, axis=0, keepdims=True)            # (1, 1)
        partial_ref[...] = jnp.broadcast_to(partial, partial_ref.shape)

    return kernel


def cross_entropy_pallas(logits, targets, *, max_rows_per_tile=8192,
                         exp_in_bf16=None):
    """F.cross_entropy(logits, targets) with mean reduction, via Pallas.

    Assumes all targets are valid class ids in [0, C); no ignore_index and no
    class weights (matching the reference usage).
    """
    n, c = logits.shape
    in_dtype = jnp.dtype(logits.dtype)
    if exp_in_bf16 is None:
        # bf16 EUP exp pays off on v6e/v7x; on v5e it is merely neutral.
        exp_in_bf16 = (in_dtype == jnp.dtype(jnp.bfloat16))

    # ---- per-generation VMEM budget ------------------------------------
    # v5e/v6e: 128 MiB physical -> ~64 MiB scoped limit; v7x: 64 MiB -> 32 MiB.
    try:
        vmem_cap = int(pltpu.get_tpu_info().vmem_capacity_bytes)
    except Exception:
        vmem_cap = 64 * 1024 * 1024  # conservative fallback (v7x physical)
    vmem_limit = int(min(vmem_cap // 2, 96 * 1024 * 1024))
    budget_bytes = vmem_limit // 2   # headroom for compiler scratch/pipelining

    # Honest per-row VMEM estimate:
    #   * double-buffered logits tile (lanes padded to 128 in VMEM only),
    #   * double-buffered (tn, 1) int32 targets block (128-lane padded!),
    #   * f32/int32 in-kernel temporaries over the (tn, c_lane) tile.
    c_lane = _round_up(c, 128)
    per_row_bytes = (2 * c_lane * in_dtype.itemsize      # logits, 2 buffers
                     + 2 * 128 * 4                        # targets, 2 buffers
                     + 5 * c_lane * 4                     # f32/i32 temporaries
                     + 128)
    tn = min(max_rows_per_tile, budget_bytes // per_row_bytes)
    # Keep >= 2 grid tiles whenever possible so the "parallel" axis can feed
    # both TensorCores on v7x.
    tn = min(tn, _round_up((n + 1) // 2, 8))
    tn = max(8, (tn // 8) * 8)

    num_tiles = pl.cdiv(n, tn)

    tgt = targets.astype(jnp.int32).reshape(n, 1)

    partials = pl.pallas_call(
        _make_ce_kernel(n, tn, exp_in_bf16),
        grid=(num_tiles,),
        in_specs=[
            # Full-C block (no HBM pad); last tile may overhang the row axis.
            pl.BlockSpec((tn, c), lambda i: (i, 0)),
            pl.BlockSpec((tn, 1), lambda i: (i, 0)),
        ],
        out_specs=pl.BlockSpec((1, 8, 128), lambda i: (i, 0, 0)),
        out_shape=jax.ShapeDtypeStruct((num_tiles, 8, 128), jnp.float32),
        compiler_params=pltpu.CompilerParams(
            dimension_semantics=("parallel",),   # independent per-tile outputs
            vmem_limit_bytes=vmem_limit,
        ),
    )(logits, tgt)

    # tiny final reduction (num_tiles elements) in plain JAX; divide by true N
    return jnp.sum(partials[:, 0, 0]) / n


class SetCriterion:
    """JAX/Pallas port of the PyTorch SetCriterion forward pass ('score')."""

    def __init__(self, losses, max_rows_per_tile=8192):
        self.losses = losses
        self.max_rows_per_tile = max_rows_per_tile

    def loss_score(self, outputs, targets):
        assert 'score' in outputs
        src_scores = outputs['score']          # (N, num_classes) logits
        _target_text, target_scores = targets  # target_scores: (N,) class ids
        loss = cross_entropy_pallas(
            src_scores, target_scores, max_rows_per_tile=self.max_rows_per_tile)
        return {'loss_score': loss}

    # TODO(synk): loss_text (CTC over ragged, mask-filtered sequences) has no
    # clean Pallas equivalent and is intentionally not implemented.

    def get_loss(self, loss, outputs, targets):
        loss_map = {'score': self.loss_score}
        assert loss in loss_map, f'do you really want to compute {loss} loss?'
        return loss_map[loss](outputs, targets)

    def forward(self, outputs, targets):
        losses = {}
        for loss in self.losses:
            losses.update(self.get_loss(loss, outputs, targets))
        return losses

    __call__ = forward


if __name__ == "__main__":
    key = jax.random.PRNGKey(0)
    k_logits, k_tgt = jax.random.split(key)

    # small synthetic shapes: 100 detections x 37 score classes (bf16 logits).
    # N=100 is deliberately not a multiple of the tile and C=37 is not
    # lane-aligned, so both the partial-final-block path and the full-C
    # (non-128) block path are exercised, and the >=2-tile cap gives a 2-step
    # "parallel" grid.
    N, C = 100, 37
    logits = jax.random.normal(k_logits, (N, C), dtype=jnp.float32)
    logits = logits.astype(jnp.bfloat16)
    target_scores = jax.random.randint(k_tgt, (N,), 0, C, dtype=jnp.int32)
    target_text = None  # unused by the 'score' loss branch

    criterion = SetCriterion(losses=['score'])
    outputs = {'score': logits}
    targets = (target_text, target_scores)

    result = criterion(outputs, targets)
    loss_val = jax.block_until_ready(result['loss_score'])

    # Sanity check against a pure-JAX f32 reference of F.cross_entropy (mean).
    # Tolerance is relaxed to ~1% because the kernel evaluates exp in bf16 and
    # accumulates the row sums on the MXU (default bf16-pass precision, f32
    # accumulation); a wrong gather/mask would be off by O(1).
    lf = logits.astype(jnp.float32)
    ref = jnp.mean(
        jax.nn.logsumexp(lf, axis=-1)
        - jnp.take_along_axis(lf, target_scores[:, None], axis=-1)[:, 0]
    )
    assert jnp.isfinite(loss_val), loss_val
    assert jnp.allclose(loss_val, ref, rtol=1e-2, atol=1e-2), (loss_val, ref)

    print("KERNEL_OK")
</pallas_src>

<mosaic_0001>
module attributes {stable_mosaic.version = 11 : i64} {
  func.func @kernel(%arg0: i32, %arg1: memref<56x37xbf16, #tpu.memory_space<vmem>>, %arg2: memref<56x1xi32, #tpu.memory_space<vmem>>, %arg3: memref<1x8x128xf32, #tpu.memory_space<vmem>>) attributes {dimension_semantics = [#tpu.dimension_semantics<parallel>], iteration_bounds = array<i64: 2>, scalar_prefetch = 0 : i64, scratch_operands = 0 : i64, tpu.core_type = #tpu.core_type<tc>, window_params = [{transform_indices = @transform_0, window_bounds = array<i64: 56, 37>}, {transform_indices = @transform_1, window_bounds = array<i64: 56, 1>}, {transform_indices = @transform_2, window_bounds = array<i64: 1, 8, 128>}]} {
    %c0 = arith.constant 0 : index
    %c0_0 = arith.constant 0 : index
    %0 = vector.load %arg1[%c0, %c0_0] : memref<56x37xbf16, #tpu.memory_space<vmem>>, vector<56x37xbf16>
    %1 = arith.extf %0 : vector<56x37xbf16> to vector<56x37xf32>
    %c0_1 = arith.constant 0 : index
    %c0_2 = arith.constant 0 : index
    %2 = vector.load %arg2[%c0_1, %c0_2] : memref<56x1xi32, #tpu.memory_space<vmem>>, vector<56x1xi32>
    %c56_i32 = arith.constant 56 : i32
    %3 = arith.muli %arg0, %c56_i32 : i32
    %4 = tpu.iota {dimensions = array<i32: 0>} : vector<56x1xi32>
    %5 = vector.broadcast %3 : i32 to vector<56x1xi32>
    %6 = arith.addi %5, %4 : vector<56x1xi32>
    %c100_i32 = arith.constant 100 : i32
    %7 = vector.broadcast %c100_i32 : i32 to vector<56x1xi32>
    %8 = arith.cmpi slt, %6, %7 : vector<56x1xi32>
    %cst = arith.constant 0.000000e+00 : f32
    %9 = vector.shape_cast %8 : vector<56x1xi1> to vector<56x1xi1>
    %10 = vector.broadcast %9 : vector<56x1xi1> to vector<56x37xi1>
    %11 = vector.broadcast %cst : f32 to vector<56x37xf32>
    %12 = arith.select %10, %1, %11 : vector<56x37xi1>, vector<56x37xf32>
    %cst_3 = arith.constant dense<0xFF800000> : vector<56xf32>
    %13 = vector.multi_reduction <maximumf>, %12, %cst_3 [1] : vector<56x37xf32> to vector<56xf32>
    %14 = vector.shape_cast %13 : vector<56xf32> to vector<56x1xf32>
    %15 = vector.broadcast %14 : vector<56x1xf32> to vector<56x37xf32>
    %16 = arith.subf %12, %15 : vector<56x37xf32>
    %17 = arith.truncf %16 : vector<56x37xf32> to vector<56x37xbf16>
    %18 = math.exp %17 : vector<56x37xbf16>
    %19 = tpu.iota {dimensions = array<i32: 1>} : vector<56x37xi32>
    %20 = vector.broadcast %2 : vector<56x1xi32> to vector<56x37xi32>
    %21 = arith.cmpi eq, %19, %20 : vector<56x37xi32>
    %cst_4 = arith.constant 0.000000e+00 : f32
    %22 = vector.broadcast %cst_4 : f32 to vector<56x37xf32>
    %23 = arith.select %21, %12, %22 : vector<56x37xi1>, vector<56x37xf32>
    %cst_5 = arith.constant 1.000000e+00 : bf16
    %24 = vector.broadcast %cst_5 : bf16 to vector<37x8xbf16>
    %cst_6 = arith.constant 1.000000e+00 : f32
    %25 = vector.broadcast %cst_6 : f32 to vector<37x8xf32>
    %cst_7 = arith.constant dense<0.000000e+00> : vector<56x8xf32>
    %26 = tpu.matmul %18, %24, %cst_7 {dimension_numbers = #tpu.dot_dimension_numbers<[1], [0], [0], [1], [0, 0, 1, 1], [], []>} : vector<56x37xbf16>, vector<37x8xbf16>, vector<56x8xf32> -> vector<56x8xf32>
    %27 = vector.extract_strided_slice %26 {offsets = [0, 0], sizes = [56, 1], strides = [1, 1]} : vector<56x8xf32> to vector<56x1xf32>
    %cst_8 = arith.constant dense<0.000000e+00> : vector<56x8xf32>
    %28 = tpu.matmul %23, %25, %cst_8 {dimension_numbers = #tpu.dot_dimension_numbers<[1], [0], [0], [1], [0, 0, 1, 1], [], []>} : vector<56x37xf32>, vector<37x8xf32>, vector<56x8xf32> -> vector<56x8xf32>
    %29 = vector.extract_strided_slice %28 {offsets = [0, 0], sizes = [56, 1], strides = [1, 1]} : vector<56x8xf32> to vector<56x1xf32>
    %30 = math.log %27 : vector<56x1xf32>
    %31 = arith.addf %14, %30 : vector<56x1xf32>
    %32 = arith.subf %31, %29 : vector<56x1xf32>
    %cst_9 = arith.constant 0.000000e+00 : f32
    %33 = vector.broadcast %cst_9 : f32 to vector<56x1xf32>
    %34 = arith.select %8, %32, %33 : vector<56x1xi1>, vector<56x1xf32>
    %cst_10 = arith.constant dense<0.000000e+00> : vector<1xf32>
    %35 = vector.multi_reduction <add>, %34, %cst_10 [0] : vector<56x1xf32> to vector<1xf32>
    %36 = vector.shape_cast %35 : vector<1xf32> to vector<1x1xf32>
    %37 = vector.shape_cast %36 : vector<1x1xf32> to vector<1x1x1xf32>
    %38 = vector.broadcast %37 : vector<1x1x1xf32> to vector<1x8x128xf32>
    %c0_11 = arith.constant 0 : index
    %c0_12 = arith.constant 0 : index
    %c0_13 = arith.constant 0 : index
    %39 = vector.load %arg3[%c0_11, %c0_12, %c0_13] : memref<1x8x128xf32, #tpu.memory_space<vmem>>, vector<1x8x128xf32>
    tpu.vector_store %arg3[%c0_11, %c0_12, %c0_13], %38 {strides = array<i32>} : memref<1x8x128xf32, #tpu.memory_space<vmem>>, vector<1x8x128xf32>,
    return
  }
  func.func @transform_0(%arg0: i32) -> (i32, i32) {
    %c0_i32 = arith.constant 0 : i32
    %c0_i32_0 = arith.constant 0 : i32
    return %arg0, %c0_i32 : i32, i32
  }
  func.func @transform_1(%arg0: i32) -> (i32, i32) {
    %c0_i32 = arith.constant 0 : i32
    %c0_i32_0 = arith.constant 0 : i32
    return %arg0, %c0_i32 : i32, i32
  }
  func.func @transform_2(%arg0: i32) -> (i32, i32, i32) {
    %c0_i32 = arith.constant 0 : i32
    %c0_i32_0 = arith.constant 0 : i32
    %c0_i32_1 = arith.constant 0 : i32
    return %arg0, %c0_i32, %c0_i32_0 : i32, i32, i32
  }
}

</mosaic_0001>

<bundles_post_ra>
// kernel: tpu_custom_call.1
= control target key start
LH: loop header
LB: loop body
LE: loop exit
PB: predicated region body
PF: predicated region fallthrough
CT: control target
= control target key end

     0   :  { %7 = vsyncpa [#allocation3], 0  ;;  %s1066_s0 = inlined_call_operand.vmem [shape: bf16[100,37], index: 0, kind: input, shape index: {}]   ;;  %s1067_s1 = inlined_call_operand.vmem [shape: s32[100,1], index: 1, kind: input, shape index: {}]   ;;  %s1068_s2 = inlined_call_operand.hbm [shape: f32[2,8,128], index: 2, kind: output, shape index: {}]  }
   0x1   :  { %9 = vsyncpa [#allocation3 + $0x1], 0  ;;  %s829_s9 = smov 0   ;;  %s831_s10 = smov 0  }
   0x2   :  { %s833_s11 = smov 0   ;;  %s835_s12 = smov 0  }
   0x3 LB: > { %s850_s13 = sadd.s32 4294967295, %s808_s12   ;;  %s627_s14 = sadd.s32 4294967294, %s808_s12   ;;  %s808_s12 = sphi %s835_s12, %s1074_s12   ;;  %s804_s11 = sphi %s833_s11, %s1073_s11   ;;  %s800_s10 = sphi %s831_s10, %s1072_s10   ;;  %s796_s9 = sphi %s829_s9, %s1071_s9  }
   0x4   : > { %s854_s15 = sadd.s32 1, %s808_s12   ;;  %s74_s16 = sadd.s32 1, %s804_s11 }
   0x5   : > { %s71_s17 = ssub.s32 %s808_s12, %s854_s15  ;;  %p84_p0 = scmp.ne.s32.totalorder %s804_s11, %s800_s10 }
   0x6   : > { %p72_p1 = scmp.eq.s32.totalorder %s71_s17, 0  ;;  %p85_p2 = scmp.eq.s32.totalorder %s850_s13, 1 }
   0x7   : > { %p90_p3 = scmp.ne.s32.totalorder %s800_s10, %s796_s9  ;;  %p91_p4 = scmp.eq.s32.totalorder %s627_s14, 1 }
   0x8   : > { %s865_s18 = scalar_select %p72_p1, %s804_s11, %s74_s16  }
   0x9   : > { %p867_p5 = por %p85_p2, %p84_p0  ;;  %p871_p6 = por %p91_p4, %p90_p3 }
   0xa   : > { %p630_p7 = scmp.ge.s32.totalorder %s808_s12, 1  ;;  %p143_p8 = scmp.lt.s32.totalorder %s808_s12, 3 }
   0xc   : > { %p144_p9 = pnand %p630_p7, %p143_p8 }
   0xd   : > { %s178_s21 = smul.u32 (!%p144_p9), 7, %s850_s13  ;;  %s175_s3 = sand.u32 (!%p144_p9), 1, %s800_s10  }
   0xe   : > { %147 = sbr.rel (%p144_p9) target bundleno = 453 (0x1c5), region = 28  ;;  %s631_s4 = sshll.u32 (!%p144_p9), %s175_s3, 3 }
   0xf   : > { %s229_s22 = smul.u32 (!%p144_p9), 56, %s850_s13  ;;  %p183_p10 = scmp.lt.s32.totalorder (!%p144_p9), %s178_s21, 12 }
  0x10   : > { %s647_s5 = sshll.u32 (!%p144_p9), %s850_s13, 3  ;;  %s177_s14 = scalar_lea.vmem (!%p144_p9), [#allocation2], %s631_s4 }
  0x11   : > { %s551_s8 = scalar_lea.hbm (!%p144_p9), %s1068_s2, %s647_s5  ;;  %s553_s16 = sshll.u32 (!%p144_p9), %s177_s14, 4  ;;  %s554_s16 = int_to_ptr.vmem [resolvable:$true] %s553_s16 }
  0x12   : > { %s555_s17 = sshll.u32 (!%p144_p9), %s551_s8, 4  ;;  %s766_s25 = scalar_lea.hbm (!%p144_p9), %s1068_s2, 16  ;;  %s556_s17 = int_to_ptr.hbm [resolvable:$true] %s555_s17 }
  0x13   : > { %v230_v0 = vlaneseq  ;;  %v810_v1 = vmov 0   ;;  %v238_v3 = vstv %s229_s22  ;;  %s1076_s21 = smov (!%p183_p10, %s178_s21), 12  ;;  %vm274_vm0 = vcmask 302080   ;;  %s760_s22 = sshra.s32 %s556_s17, 4  ;;  %s761_s22 = int_to_ptr.hbm [resolvable:$true] %s760_s22 }
  0x14   : > { %715 = vset.pattern.permute.xlu1 %v810_v1  ;;  %717 = vset.pattern.permute.xlu0 %v810_v1  ;;  %s632_s23 = sshll.u32 %s1076_s21, 2  ;;  %s633_s27 = sshll.u32 %s1076_s21, 3  ;;  %vm381_vm8 = vcmask 1041408   ;;  %vm382_vm9 = vcmask 1042432   ;;  %v811_v49 = vmov 65535   ;;  %vm437_vm10 = vcmask 1044480  }
  0x15   : > { %v231_v2 = vshrl.u32 %v230_v0, 7  ;;  %716 = vset.pattern.permute.xlu2 %v810_v1  ;;  %s894_s26 = scalar_lea.vmem %s1066_s0, %s632_s23  ;;  %s200_s30 = scalar_lea.vmem %s1067_s1, %s633_s27  ;;  %v383_v50 = vsel %vm381_vm8, 4294967295, %v811_v49  ;;  %v812_v53 = vmov 1065369472   ;;  %v813_v54 = vmov 1.0  }
  0x16   : > { %v663_v14 = vld [vmem:[%s894_s26 + $0x10] sm:$0xff]   ;;  %v651_v15 = vld [vmem:[%s894_s26] sm:$0xff]   ;;  %v662_v16 = vld [vmem:[%s894_s26 + $0x8] sm:$0xff]   ;;  %v384_v51 = vsel %vm382_vm9, %v383_v50, 0  ;;  %638 = vmatpush.msk.msra.mxu1 %vm437_vm10, %v813_v54  ;;  %667 = vmatpush.msk.msra.mxu3 %vm437_vm10, %v813_v54  ;;  %s541_s21 = scalar_lea.sflag [#allocation3], %s175_s3  ;;  %s762_s23 = scalar_lea.hbm %s761_s22, 8 }
  0x17   : > { %v235_v4 = vadd.s32 32, %v231_v2  ;;  %v882_v5 = vadd.s32 %v238_v3, %v231_v2  ;;  %v236_v6 = vadd.s32 40, %v231_v2  ;;  %v233_v7 = vadd.s32 16, %v231_v2  ;;  %v214_v34 = vld [vmem:[%s894_s26 + $0x18] sm:$0xf]  ;;  %v222_v42 = vld [vmem:[%s200_s30] sm:$0xff]  ;;  %p763_p11 = scmp.ne.s32.totalorder %s761_s22, %s762_s23  ;;  %p767_p0 = scmp.lt.s32.totalorder %s761_s22, %s1068_s2 }
  0x18   : > { %v232_v8 = vadd.s32 8, %v231_v2  ;;  %v234_v9 = vadd.s32 24, %v231_v2  ;;  %v660_v17 = vunpack.c.l.bf16 %v663_v14  ;;  %v652_v18 = vunpack.c.l.bf16 %v651_v15  ;;  %v223_v43 = vld [vmem:[%s200_s30 + $0x8] sm:$0xff]  ;;  %v226_v44 = vld [vmem:[%s200_s30 + $0x20] sm:$0xff]  ;;  %v224_v46 = vld [vmem:[%s200_s30 + $0x10] sm:$0xff]  ;;  %453 = vmatpush.msra.mxu1 %v813_v54  ;;  %668 = vmatpush.msra.mxu3 %v813_v54  ;;  %p768_p1 = scmp.lt.s32.totalorder %s766_s25, %s762_s23 }
  0x19   : > { %v885_v10 = vadd.s32 %v238_v3, %v235_v4  ;;  %v887_v11 = vadd.s32 %v238_v3, %v236_v6  ;;  %v889_v12 = vadd.s32 %v238_v3, %v233_v7  ;;  %vm246_vm2 = vcmp.lt.s32.totalorder %v882_v5, 100  ;;  %v227_v45 = vld [vmem:[%s200_s30 + $0x28] sm:$0xff]  ;;  %v228_v47 = vld [vmem:[%s200_s30 + $0x30] sm:$0xff]  ;;  %v225_v48 = vld [vmem:[%s200_s30 + $0x18] sm:$0xff]  ;;  %p764_p12 = pnand %p763_p11, %p867_p5 }
  0x1a   : > { %v896_v13 = vadd.s32 %v238_v3, %v232_v8  ;;  %v656_v19 = vunpack.c.l.bf16 %v662_v16  ;;  %v904_v20 = vadd.s32 %v238_v3, %v234_v9  ;;  %v661_v21 = vunpack.c.h.bf16 %v663_v14  ;;  %454 = vmatpush.msra.mxu1 %v813_v54  ;;  %669 = vmatpush.msra.mxu3 %v813_v54  ;;  %p769_p2 = por %p768_p1, %p767_p0 }
  0x1b   : > { %vm250_vm1 = vcmp.lt.s32.totalorder %v885_v10, 100  ;;  %vm248_vm3 = vcmp.lt.s32.totalorder %v889_v12, 100  ;;  %vm251_vm4 = vcmp.lt.s32.totalorder %v887_v11, 100  ;;  %v653_v22 = vunpack.c.h.bf16 %v651_v15  ;;  %p765_p13 = pneg %p764_p12 }
  0x1c   : > { %v237_v23 = vadd.s32 48, %v231_v2  ;;  %v909_v24 = vsel %vm250_vm1, %v660_v17, 0.0  ;;  %v913_v25 = vsel %vm246_vm2, %v652_v18, 0.0  ;;  %v917_v26 = vsel %vm248_vm3, %v656_v19, 0.0  ;;  %455 = vmatpush.msra.mxu1 %v813_v54  ;;  %670 = vmatpush.msra.mxu3 %v813_v54 }
  0x1d   : > { %vm247_vm5 = vcmp.lt.s32.totalorder %v896_v13, 100  ;;  %v287_v27 = vsel %vm274_vm0, %v909_v24, -inf  ;;  %v275_v28 = vsel %vm274_vm0, %v913_v25, -inf  ;;  %v281_v29 = vsel %vm274_vm0, %v917_v26, -inf  ;;  %p770_p3 = pnand %p769_p2, %p765_p13 }
  0x1e   : > { %v657_v30 = vunpack.c.h.bf16 %v662_v16  ;;  %288 = vmax.xlane.f32.xlu1 %v287_v27  ;;  %276 = vmax.xlane.f32.xlu0 %v275_v28  ;;  %vm249_vm6 = vcmp.lt.s32.totalorder %v904_v20, 100  ;;  %v929_v31 = vsel %vm251_vm4, %v661_v21, 0.0  ;;  %v933_v32 = vsel %vm247_vm5, %v653_v22, 0.0 }
  0x1f   : > { %282 = vmax.xlane.f32.xlu2 %v281_v29  ;;  %v940_v35 = vadd.s32 %v238_v3, %v237_v23  ;;  %v290_v36 = vsel %vm274_vm0, %v929_v31, -inf  ;;  %v278_v37 = vsel %vm274_vm0, %v933_v32, -inf  ;;  %v221_v39 = vunpack.c.l.bf16 %v214_v34  ;;  %456 = vmatpush.msra.mxu1 %v813_v54 }
  0x20   : > { %v937_v33 = vsel %vm249_vm6, %v657_v30, 0.0  ;;  %v386_v52 = vand.u32 1065369472, %v384_v51  ;;  %671 = vmatpush.msra.mxu3 %v813_v54 }
  0x21   : > { %v284_v38 = vsel %vm274_vm0, %v937_v33, -inf  ;;  %vm252_vm7 = vcmp.lt.s32.totalorder %v940_v35, 100 }
  0x22   : > { %v951_v40 = vsel %vm252_vm7, %v221_v39, 0.0  ;;  %393 = vmatpush.bf16.msra.mxu0 %v386_v52  ;;  %664 = vmatpush.bf16.msra.mxu2 %v386_v52 }
  0x23   : > { %v293_v41 = vsel %vm274_vm0, %v951_v40, -inf }
  0x26   : > { %291 = vmax.xlane.f32.xlu1 %v290_v36  ;;  %279 = vmax.xlane.f32.xlu0 %v278_v37 }
  0x27   : > { %285 = vmax.xlane.f32.xlu2 %v284_v38  ;;  %394 = vmatpush.bf16.msra.mxu0 %v812_v53 }
  0x28   : > { %665 = vmatpush.bf16.msra.mxu2 %v812_v53 }
  0x2b   : > { %395 = vmatpush.bf16.msra.mxu0 %v812_v53 }
  0x2c   : > { %666 = vmatpush.bf16.msra.mxu2 %v812_v53 }
  0x2e   : > { %294 = vmax.xlane.f32.xlu0 %v293_v41 }
  0x3f   : > { %335 = vperm.xlu1 %715, %v222_v42   ;;  %338 = vperm.xlu2 %716, %v223_v43   ;;  %v333_v43 = vand.u32 127, %v230_v0 }
  0x42   : > { %347 = vperm.xlu0 %717, %v226_v44  }
  0x47   : > { %350 = vperm.xlu1 %715, %v227_v45   ;;  %341 = vperm.xlu2 %716, %v224_v46  }
  0x4f   : > { %353 = vperm.xlu1 %715, %v228_v47   ;;  %344 = vperm.xlu2 %716, %v225_v48  }
  0x91   : > { %v959_v55 = vpop.xlane.xlu1 %288  ;;  %v961_v56 = vpop.xlane.xlu0 %276 }
  0x92   : > { %v963_v57 = vpop.xlane.xlu2 %282  ;;  %v300_v60 = vsub.f32 %v909_v24, %v959_v55  ;;  %v296_v61 = vsub.f32 %v913_v25, %v961_v56 }
  0x93   : > { %v298_v18 = vsub.f32 %v917_v26, %v963_v57 }
  0x99   : > { %v965_v58 = vpop.xlane.xlu1 %291  ;;  %v967_v59 = vpop.xlane.xlu0 %279 }
  0x9a   : > { %v301_v62 = vsub.f32 %v929_v31, %v965_v58  ;;  %v297_v63 = vsub.f32 %v933_v32, %v967_v59  ;;  %v977_v8 = vpop.xlane.xlu2 %285 }
  0x9b   : > { %v299_v19 = vsub.f32 %v937_v33, %v977_v8 }
  0x9c   : > { %v305_v1 = vpack.c.bf16 %v301_v62, %v300_v60  ;;  %v303_v2 = vpack.c.bf16 %v297_v63, %v296_v61 }
  0x9d   : > { %v304_v23 = vpack.c.bf16 %v299_v19, %v298_v18 }
  0x9e   : > { %v311_v3 = vunpack.c.l.bf16 %v305_v1  ;;  %v312_v4 = vunpack.c.h.bf16 %v305_v1  ;;  %v307_v6 = vunpack.c.l.bf16 %v303_v2  ;;  %v308_v7 = vunpack.c.h.bf16 %v303_v2 }
  0x9f   : > { %v309_v34 = vunpack.c.l.bf16 %v304_v23  ;;  %v310_v38 = vunpack.c.h.bf16 %v304_v23 }
  0xa0   : > { %v322_v9 = vmul.f32 1.442695, %v311_v3  ;;  %v324_v14 = vmul.f32 1.442695, %v312_v4  ;;  %v314_v15 = vmul.f32 1.442695, %v307_v6 }
  0xa1   : > { %v316_v16 = vmul.f32 1.442695, %v308_v7  ;;  %v979_v17 = vpop.xlane.xlu0 %294  ;;  %v318_v42 = vmul.f32 1.442695, %v309_v34  ;;  %v320_v44 = vmul.f32 1.442695, %v310_v38 }
  0xa2   : > { %718 = vpow2.f32 %v322_v9  ;;  %v302_v21 = vsub.f32 %v951_v40, %v979_v17  ;;  %v339_v45 = vpop.permute.xlu2 %338 }
  0xa3   : > { %720 = vpow2.f32 %v324_v14  ;;  %vm356_vm13 = vcmp.eq.s32.totalorder %v333_v43, %v339_v45 }
  0xa4   : > { %722 = vpow2.f32 %v314_v15  ;;  %v306_v22 = vpack.c.bf16 %v302_v21, %v302_v21  ;;  %v363_v53 = vsel %vm356_vm13, %v933_v32, 0.0 }
  0xa5   : > { %724 = vpow2.f32 %v316_v16 }
  0xa6   : > { %v313_v27 = vunpack.c.l.bf16 %v306_v22 }
  0xa8   : > { %v719_v28 = vpop.eup %718  ;;  %v326_v39 = vmul.f32 1.442695, %v313_v27 }
  0xa9   : > { %v721_v29 = vpop.eup %720 }
  0xaa   : > { %v723_v30 = vpop.eup %722  ;;  %v330_v36 = vpack.c.bf16 %v721_v29, %v719_v28  ;;  %726 = vpow2.f32 %v326_v39  ;;  %v342_v60 = vpop.permute.xlu2 %341 }
  0xab   : > { %v725_v37 = vpop.eup %724  ;;  %728 = vpow2.f32 %v318_v42  ;;  %vm357_vm15 = vcmp.eq.s32.totalorder %v333_v43, %v342_v60 }
  0xac   : > { %636 = vmatmul.msk.bf16.vlgmr.msra.gmra.mxu2 %vm274_vm0, %v330_v36  ;;  %v328_v41 = vpack.c.bf16 %v725_v37, %v723_v30  ;;  %730 = vpow2.f32 %v320_v44  ;;  %v364_v62 = vsel %vm357_vm15, %v917_v26, 0.0 }
  0xae   : > { %634 = vmatmul.msk.bf16.vlgmr.msra.gmra.mxu0 %vm274_vm0, %v328_v41 }
  0xb0   : > { %v727_v49 = vpop.eup %726 }
  0xb1   : > { %v336_v46 = vpop.permute.xlu1 %335  ;;  %v729_v0 = vpop.eup %728  ;;  %v331_v51 = vpack.c.bf16 %v727_v49, %v727_v49 }
  0xb2   : > { %vm355_vm11 = vcmp.eq.s32.totalorder %v333_v43, %v336_v46  ;;  %v731_v52 = vpop.eup %730  ;;  %v345_v32 = vpop.permute.xlu2 %344 }
  0xb3   : > { %v362_v47 = vsel %vm355_vm11, %v913_v25, 0.0  ;;  %v329_v61 = vpack.c.bf16 %v731_v52, %v729_v0  ;;  %vm358_vm9 = vcmp.eq.s32.totalorder %v333_v43, %v345_v32 }
  0xb4   : > { %639 = vmatmul.msk.f32.vlgmr.msra.gmra.mxu1 %vm274_vm0, %v362_v47  ;;  %v348_v48 = vpop.permute.xlu0 %347  ;;  %v365_v1 = vsel %vm358_vm9, %v937_v33, 0.0 }
  0xb5   : > { %vm359_vm12 = vcmp.eq.s32.totalorder %v333_v43, %v348_v48 }
  0xb6   : > { %v366_v50 = vsel %vm359_vm12, %v909_v24, 0.0 }
  0xb7   : > { %643 = vmatmul.msk.f32.vlgmr.msra.gmra.mxu3 %vm274_vm0, %v366_v50 }
  0xb9   : > { %v351_v54 = vpop.permute.xlu1 %350 }
  0xba   : > { %vm360_vm14 = vcmp.eq.s32.totalorder %v333_v43, %v351_v54 }
  0xbb   : > { %v367_v25 = vsel %vm360_vm14, %v929_v31, 0.0 }
  0xbc   : > { %637 = vmatmul.msk.bf16.gmra.mxu2 %vm274_vm0, %v331_v51  ;;  %640 = vmatmul.msk.f32.gmra.mxu1 %vm274_vm0, %v363_v53 }
  0xbe   : > { %635 = vmatmul.msk.bf16.gmra.mxu0 %vm274_vm0, %v329_v61 }
  0xbf   : > { %644 = vmatmul.msk.f32.gmra.mxu3 %vm274_vm0, %v367_v25 }
  0xc1   : > { %v354_v24 = vpop.permute.xlu1 %353 }
  0xc2   : > { %vm361_vm8 = vcmp.eq.s32.totalorder %v333_v43, %v354_v24 }
  0xc3   : > { %v368_v63 = vsel %vm361_vm8, %v951_v40, 0.0 }
  0xc4   : > { %641 = vmatmul.msk.f32.gmra.mxu1 %vm274_vm0, %v364_v62 }
  0xc7   : > { %645 = vmatmul.msk.f32.gmra.mxu3 %vm274_vm0, %v368_v63 }
  0xcc   : > { %642 = vmatmul.msk.f32.gmra.mxu1 %vm274_vm0, %v365_v1  ;;  %vm514_vm0 = vcmask 7168  }
 0x12b   : > { %v397_v31 = vpop.f32.mrf.mxu0 }
 0x12f   : > { %v407_v2 = vpop.f32.mrf.mxu2 }
 0x131   : > { %v458_v3 = vpop.f32.mrf.mxu1 }
 0x133   : > { %v399_v4 = vpop.f32.mrf.mxu0 }
 0x134   : > { %732 = vlog2.f32 %v399_v4 }
 0x135   : > { %734 = vlog2.f32 %v397_v31 }
 0x136   : > { %736 = vlog2.f32 %v407_v2 }
 0x137   : > { %v409_v26 = vpop.f32.mrf.mxu2 }
 0x139   : > { %v461_v7 = vpop.f32.mrf.mxu1 }
 0x13a   : > { %v733_v6 = vpop.eup %732  ;;  %v470_v9 = vpop.f32.mrf.mxu3 }
 0x13b   : > { %v402_v14 = vpop.f32.mrf.mxu0  ;;  %v735_v40 = vpop.eup %734  ;;  %v482_v15 = vmul.f32 0.6931472, %v733_v6 }
 0x13c   : > { %738 = vlog2.f32 %v402_v14  ;;  %v480_v16 = vmul.f32 0.6931472, %v735_v40  ;;  %v737_v18 = vpop.eup %736 }
 0x13d   : > { %740 = vlog2.f32 %v409_v26  ;;  %v494_v19 = vadd.f32 %v482_v15, %v967_v59  ;;  %v488_v34 = vmul.f32 0.6931472, %v737_v18 }
 0x13e   : > { %v493_v22 = vadd.f32 %v480_v16, %v961_v56 }
 0x13f   : > { %v412_v33 = vpop.f32.mrf.mxu2  ;;  %v501_v36 = vsub.f32 %v494_v19, %v461_v7  ;;  %v497_v56 = vadd.f32 %v488_v34, %v959_v55 }
 0x140   : > { %742 = vlog2.f32 %v412_v33  ;;  %v500_v39 = vsub.f32 %v493_v22, %v458_v3 }
 0x141   : > { %v464_v29 = vpop.f32.mrf.mxu1  ;;  %v508_v59 = vsel %vm247_vm5, %v501_v36, 0.0  ;;  %v504_v50 = vsub.f32 %v497_v56, %v470_v9 }
 0x142   : > { %v739_v21 = vpop.eup %738  ;;  %v473_v30 = vpop.f32.mrf.mxu3  ;;  %v507_v46 = vsel %vm246_vm2, %v500_v39, 0.0  ;;  %v516_v49 = vsel %vm514_vm0, %v508_v59, 0.0 }
 0x143   : > { %v484_v23 = vmul.f32 0.6931472, %v739_v21  ;;  %v404_v27 = vpop.f32.mrf.mxu0  ;;  %v741_v28 = vpop.eup %740  ;;  %v515_v55 = vsel %vm514_vm0, %v507_v46, 0.0  ;;  %v511_v12 = vsel %vm250_vm1, %v504_v50, 0.0 }
 0x144   : > { %744 = vlog2.f32 %v404_v27  ;;  %v490_v41 = vmul.f32 0.6931472, %v741_v28  ;;  %v517_v53 = vadd.f32 %v516_v49, %v515_v55  ;;  %v522_v62 = vsel %vm514_vm0, %v511_v12, 0.0 }
 0x145   : > { %v495_v37 = vadd.f32 %v484_v23, %v963_v57 }
 0x146   : > { %v743_v38 = vpop.eup %742  ;;  %v498_v48 = vadd.f32 %v490_v41, %v965_v58 }
 0x147   : > { %v502_v42 = vsub.f32 %v495_v37, %v464_v29  ;;  %v414_v43 = vpop.f32.mrf.mxu2  ;;  %v492_v44 = vmul.f32 0.6931472, %v743_v38 }
 0x148   : > { %v505_v54 = vsub.f32 %v498_v48, %v473_v30 }
 0x149   : > { %v509_v57 = vsel %vm248_vm3, %v502_v42, 0.0  ;;  %v499_v0 = vadd.f32 %v492_v44, %v979_v17  ;;  %v467_v52 = vpop.f32.mrf.mxu1 }
 0x14a   : > { %v745_v45 = vpop.eup %744  ;;  %v518_v51 = vsel %vm514_vm0, %v509_v57, 0.0  ;;  %v476_v5 = vpop.f32.mrf.mxu3  ;;  %v512_v17 = vsel %vm251_vm4, %v505_v54, 0.0 }
 0x14b   : > { %v486_v47 = vmul.f32 0.6931472, %v745_v45  ;;  %v519_v58 = vadd.f32 %v518_v51, %v517_v53  ;;  %v506_v25 = vsub.f32 %v499_v0, %v476_v5  ;;  %v524_v63 = vsel %vm514_vm0, %v512_v17, 0.0 }
 0x14d   : > { %v496_v13 = vadd.f32 %v486_v47, %v977_v8  ;;  %v513_v10 = vsel %vm252_vm7, %v506_v25, 0.0 }
 0x14e   : > { %v526_v20 = vsel %vm514_vm0, %v513_v10, 0.0 }
 0x14f   : > { %v503_v60 = vsub.f32 %v496_v13, %v467_v52 }
 0x151   : > { %v510_v61 = vsel %vm249_vm6, %v503_v60, 0.0 }
 0x152   : > { %v520_v8 = vsel %vm514_vm0, %v510_v61, 0.0 }
 0x153   : > { %v521_v24 = vadd.f32 %v520_v8, %v519_v58 }
 0x155   : > { %v523_v32 = vadd.f32 %v522_v62, %v521_v24 }
 0x157   : > { %v525_v1 = vadd.f32 %v524_v63, %v523_v32 }
 0x159   : > { %v527_v31 = vadd.f32 %v526_v20, %v525_v1 }
 0x15b   : > { %v528_v2 = vrot.slane %v527_v31, 4 }
 0x15d   : > { %v529_v3 = vadd.f32 %v528_v2, %v527_v31 }
 0x15f   : > { %v530_v4 = vrot.slane %v529_v3, 2 }
 0x161   : > { %v531_v11 = vadd.f32 %v530_v4, %v529_v3 }
 0x163   : > { %v532_v26 = vrot.slane %v531_v11, 1 }
 0x165   : > { %v533_v6 = vadd.f32 %v532_v26, %v531_v11 }
 0x167   : > { %536 = vperm.xlu2 %716, %v533_v6  }
 0x1c1   : > { %v537_v35 = vpop.permute.xlu2 %536 }
 0x1c2   : > { %539 = vst [vmem:[%s177_s14] sm:$0xff] %v537_v35 }
 0x1c3   : > { %773 = shalt.err (!%p770_p3)
}
 0x1c4   : > { %672 = dma.vmem_to_hbm [thread:$0]  (%p867_p5), %s554_s16, 128, %s556_s17, %s541_s21  }
 0x1c5 PF: > { %p678_p4 = scmp.ge.s32.totalorder %s808_s12, 2  ;;  %s567_s28 = sand.u32 1, %s796_s9  }
 0x1c6   : > { %s568_s29 = scalar_lea.sflag [#allocation3], %s567_s28 }
 0x1c7   : > { %p675_p7 = pnand %p678_p4, %p871_p6 }
 0x1c9   : > { %p676_p8 = pneg %p675_p7 }
 0x1cb   : > { %791 = dma.done.wait (%p676_p8), %s568_s29, 128  }
 0x1cc   : > { %793 = vsyncadd (%p676_p8), %s568_s29, 4294967168  ;;  %p12_p9 = scmp.ge.s32.totalorder %s854_s15, 4   ;;  %s1071_s9 = smov %s800_s10 }
 0x1cd   : > { %s1072_s10 = smov %s804_s11  ;;  %s1073_s11 = smov %s865_s18 }
 0x1ce   : > { %s1074_s12 = smov %s854_s15  ;;  %14 = sbr.rel (!%p12_p9) target bundleno = 3 (0x3), region = 66 }
 0x1d3   :  { %574 = vsyncpa [#allocation3], 1 }
 0x1d4   :  { %576 = vsyncpa [#allocation3 + $0x1], 1 }

</bundles_post_ra>
